<compile_context>
chip_gen: v5e
topology: v5e:2x2
jax: 0.10.0
libtpu: 0.0.40
codegen_flags: <defaults>
</compile_context>

<pallas_src>
import functools
import math

import jax
import jax.numpy as jnp
from jax import lax
from jax.experimental import pallas as pl
from jax.experimental.pallas import tpu as pltpu


# ---------------------------------------------------------------------------
# Tiling helpers
# ---------------------------------------------------------------------------
def _seq_block(T):
    """Sequence tile: 256 on v6e (128 MiB VMEM, 256-wide MXU), 128 otherwise,
    clamped to the power-of-two-padded sequence length."""
    pref = 128
    try:
        kind = jax.devices()[0].device_kind.lower()
        if "v6" in kind:
            pref = 256
    except Exception:
        pass
    return int(min(pref, max(8, pl.next_power_of_2(T))))


def _col_tile(n, candidates=(512, 256, 128)):
    """Column tile for the projection GEMMs (lane-dense multiples of 128,
    or the full width for small feature dims)."""
    for c in candidates:
        if n % c == 0:
            return c
    return n


# ---------------------------------------------------------------------------
# Kernel 1 & 3: tiled GEMM + bias (used for fused QKV proj and output proj).
# Contraction dim is kept whole inside the block (fine at these sizes); rows
# and columns are tiled and both grid axes are "parallel" (megacore).
# ---------------------------------------------------------------------------
def _matmul_bias_kernel(a_ref, b_ref, bias_ref, o_ref):
    acc = jnp.dot(a_ref[...], b_ref[...], preferred_element_type=jnp.float32)
    o_ref[...] = (acc + bias_ref[...]).astype(o_ref.dtype)


def _matmul_bias(a, b, bias, *, tm, tn, out_dtype):
    M, K = a.shape
    _, N = b.shape
    assert M % tm == 0 and N % tn == 0
    return pl.pallas_call(
        _matmul_bias_kernel,
        out_shape=jax.ShapeDtypeStruct((M, N), out_dtype),
        grid_spec=pltpu.PrefetchScalarGridSpec(
            num_scalar_prefetch=0,
            grid=(M // tm, N // tn),
            in_specs=[
                pl.BlockSpec((tm, K), lambda i, j: (i, 0)),
                pl.BlockSpec((K, tn), lambda i, j: (0, j)),
                pl.BlockSpec((1, tn), lambda i, j: (0, j)),
            ],
            out_specs=pl.BlockSpec((tm, tn), lambda i, j: (i, j)),
        ),
        compiler_params=pltpu.CompilerParams(
            dimension_semantics=("parallel", "parallel")),
    )(a, b, bias)


# ---------------------------------------------------------------------------
# Kernel 2: flash-attention core. grid = (B, H, nq, nk); nk is the online-
# softmax reduction axis ("arbitrary", last). Inputs are pre-projected bf16
# Q/K/V in (B, H, T, head_dim) layout; 1/sqrt(head_dim) already folded into Q.
# ---------------------------------------------------------------------------
def _flash_attn_kernel(q_ref, k_ref, v_ref, o_ref, m_scr, l_scr, acc_scr,
                       *, tq, tk):
    qi = pl.program_id(2)
    ki = pl.program_id(3)
    nk = pl.num_programs(3)

    @pl.when(ki == 0)
    def _init():
        m_scr[...] = jnp.full_like(m_scr, -jnp.inf)
        l_scr[...] = jnp.zeros_like(l_scr)
        acc_scr[...] = jnp.zeros_like(acc_scr)

    # Skip key tiles that lie entirely in the causal future (their DMA is also
    # skipped via the clamped index_map in the wrapper).
    @pl.when(ki * tk <= qi * tq + (tq - 1))
    def _update():
        q = q_ref[0, 0]                                   # (tq, hd) bf16, pre-scaled
        k = k_ref[0, 0]                                   # (tk, hd) bf16
        v = v_ref[0, 0]                                   # (tk, hd) bf16

        # s = q @ k^T without an explicit transpose.
        s = lax.dot_general(q, k, (((1,), (1,)), ((), ())),
                            preferred_element_type=jnp.float32)   # (tq, tk) f32

        # Causal mask only on tiles straddling the diagonal; strictly-past
        # tiles take the unmasked fast path (saves VPU selects).
        def _mask(sc):
            row = qi * tq + lax.broadcasted_iota(jnp.int32, sc.shape, 0)
            col = ki * tk + lax.broadcasted_iota(jnp.int32, sc.shape, 1)
            # Finite large-negative value: defends against NaN if a row were
            # ever fully masked (exp underflows to 0 instead of inf - inf).
            return jnp.where(col > row, -1e30, sc)

        s = lax.cond(ki * tk + (tk - 1) > qi * tq, _mask, lambda sc: sc, s)

        m_prev = m_scr[...]
        m_new = jnp.maximum(m_prev, jnp.max(s, axis=-1, keepdims=True))
        p = jnp.exp(s - m_new)                            # (tq, tk) f32
        alpha = jnp.exp(m_prev - m_new)                   # (tq, 1)  f32

        l_scr[...] = alpha * l_scr[...] + jnp.sum(p, axis=-1, keepdims=True)
        acc_scr[...] = alpha * acc_scr[...] + jnp.dot(
            p.astype(jnp.bfloat16), v, preferred_element_type=jnp.float32)
        m_scr[...] = m_new

    @pl.when(ki == nk - 1)
    def _finalize():
        # Exact reciprocal: runs once per (b, h, q-tile); cost is negligible.
        o_ref[0, 0] = (acc_scr[...] / l_scr[...]).astype(o_ref.dtype)


def _flash_attention(q, k, v, *, tq, tk):
    B, H, T, hd = q.shape
    nq, nk = T // tq, T // tk
    kernel = functools.partial(_flash_attn_kernel, tq=tq, tk=tk)

    # Clamp future key-tile indices to the last causally relevant block: the
    # block index does not change once past the diagonal, so Pallas issues no
    # new DMA for fully-masked tiles (compute is skipped by pl.when).
    def kv_index(b, h, qi, ki):
        last = (qi * tq + tq - 1) // tk
        return (b, h, jnp.minimum(ki, last), 0)

    return pl.pallas_call(
        kernel,
        out_shape=jax.ShapeDtypeStruct((B, H, T, hd), jnp.bfloat16),
        grid_spec=pltpu.PrefetchScalarGridSpec(
            num_scalar_prefetch=0,
            grid=(B, H, nq, nk),
            in_specs=[
                pl.BlockSpec((1, 1, tq, hd), lambda b, h, qi, ki: (b, h, qi, 0)),
                pl.BlockSpec((1, 1, tk, hd), kv_index),
                pl.BlockSpec((1, 1, tk, hd), kv_index),
            ],
            out_specs=pl.BlockSpec((1, 1, tq, hd),
                                   lambda b, h, qi, ki: (b, h, qi, 0)),
            scratch_shapes=[
                pltpu.VMEM((tq, 1), jnp.float32),    # running max m
                pltpu.VMEM((tq, 1), jnp.float32),    # running denom l
                pltpu.VMEM((tq, hd), jnp.float32),   # context accumulator
            ],
        ),
        # Per-step VMEM footprint is a few (tile, hd) bf16 blocks -> default
        # scoped VMEM limits are ample on v5e/v6e/v7x; no override needed.
        compiler_params=pltpu.CompilerParams(
            dimension_semantics=("parallel", "parallel", "parallel",
                                 "arbitrary")),
    )(q, k, v)


# ---------------------------------------------------------------------------
# Full MHA forward (matches the PyTorch module with dropout = identity).
# ---------------------------------------------------------------------------
def multi_head_attention(x, wq, wk, wv, wo, bo, *, num_heads):
    """x: (B, T, d_in); wq/wk/wv: (d_in, d_out); wo: (d_out, d_out); bo: (d_out,).
    Weights are pre-transposed to (in_features, out_features): y = x @ W + b."""
    B, T, d_in = x.shape
    d_out = wq.shape[1]
    assert d_out % num_heads == 0
    head_dim = d_out // num_heads
    scale = 1.0 / math.sqrt(head_dim)
    out_dtype = x.dtype

    # --- tiling / padding ---------------------------------------------------
    blk = _seq_block(T)
    T_pad = pl.cdiv(T, blk) * blk
    if T_pad != T:
        # Padded keys are causally masked for real queries; padded query rows
        # are sliced off at the end.
        x = jnp.pad(x, ((0, 0), (0, T_pad - T), (0, 0)))
    rows = B * T_pad

    # --- bf16 once in the wrapper; scale folded into W_query -----------------
    x_b = x.astype(jnp.bfloat16)
    w_qkv = jnp.concatenate([wq * scale, wk, wv], axis=1).astype(jnp.bfloat16)
    wo_b = wo.astype(jnp.bfloat16)
    bo2 = bo.reshape(1, d_out).astype(jnp.float32)
    zero_bias = jnp.zeros((1, 3 * d_out), jnp.float32)   # qkv_bias=False

    tn_qkv = _col_tile(3 * d_out)
    tn_out = _col_tile(d_out)

    # --- (1) fused QKV projection (hoisted out of the flash loop) -----------
    qkv = _matmul_bias(x_b.reshape(rows, d_in), w_qkv, zero_bias,
                       tm=blk, tn=tn_qkv, out_dtype=jnp.bfloat16)
    qkv = qkv.reshape(B, T_pad, 3, num_heads, head_dim)
    qkv = qkv.transpose(2, 0, 3, 1, 4)                    # (3, B, H, T_pad, hd)
    q, k, v = qkv[0], qkv[1], qkv[2]

    # --- (2) flash attention core --------------------------------------------
    ctx = _flash_attention(q, k, v, tq=blk, tk=blk)       # (B, H, T_pad, hd) bf16

    # --- (3) monolithic output projection ------------------------------------
    ctx = ctx.transpose(0, 2, 1, 3).reshape(rows, d_out)  # (B*T_pad, d_out)
    out = _matmul_bias(ctx, wo_b, bo2, tm=blk, tn=tn_out, out_dtype=out_dtype)
    return out.reshape(B, T_pad, d_out)[:, :T, :]


# ---------------------------------------------------------------------------
# Pure-JAX f32 reference mirroring the PyTorch forward (dropout = identity).
# ---------------------------------------------------------------------------
def _reference(x, wq, wk, wv, wo, bo, *, num_heads):
    B, T, d_in = x.shape
    d_out = wq.shape[1]
    head_dim = d_out // num_heads
    q = (x @ wq).reshape(B, T, num_heads, head_dim).transpose(0, 2, 1, 3)
    k = (x @ wk).reshape(B, T, num_heads, head_dim).transpose(0, 2, 1, 3)
    v = (x @ wv).reshape(B, T, num_heads, head_dim).transpose(0, 2, 1, 3)
    s = jnp.einsum('bhtd,bhsd->bhts', q, k)
    mask = jnp.triu(jnp.ones((T, T), bool), k=1)
    s = jnp.where(mask, -jnp.inf, s) / math.sqrt(head_dim)
    w = jax.nn.softmax(s, axis=-1)
    ctx = jnp.einsum('bhts,bhsd->bhtd', w, v).transpose(0, 2, 1, 3).reshape(B, T, d_out)
    return ctx @ wo + bo


if __name__ == "__main__":
    # Small shapes consistent with the module.
    B, T, d_in, d_out, num_heads = 2, 8, 16, 32, 4
    # TODO(synk): dropout on attention weights is identity here (eval mode / p=0).

    key = jax.random.PRNGKey(0)
    kx, kq, kk, kv, ko, kb = jax.random.split(key, 6)

    x = jax.random.normal(kx, (B, T, d_in), dtype=jnp.float32)

    # Deterministic parameter init (PyTorch-Linear-style uniform bounds),
    # stored pre-transposed as (in_features, out_features).
    bound_qkv = 1.0 / math.sqrt(d_in)
    bound_o = 1.0 / math.sqrt(d_out)
    wq = jax.random.uniform(kq, (d_in, d_out), jnp.float32, -bound_qkv, bound_qkv)
    wk = jax.random.uniform(kk, (d_in, d_out), jnp.float32, -bound_qkv, bound_qkv)
    wv = jax.random.uniform(kv, (d_in, d_out), jnp.float32, -bound_qkv, bound_qkv)
    wo = jax.random.uniform(ko, (d_out, d_out), jnp.float32, -bound_o, bound_o)
    bo = jax.random.uniform(kb, (d_out,), jnp.float32, -bound_o, bound_o)

    out = multi_head_attention(x, wq, wk, wv, wo, bo, num_heads=num_heads)
    out = jax.block_until_ready(out)

    ref = _reference(x, wq, wk, wv, wo, bo, num_heads=num_heads)
    assert out.shape == (B, T, d_out)
    # Tolerance loosened vs the f32 reference because the MXU operands are bf16
    # (softmax statistics and accumulators stay f32).
    assert jnp.allclose(out, ref, atol=2e-2, rtol=2e-2), "mismatch vs reference"

    print("KERNEL_OK")
</pallas_src>

<mosaic_0001>
module attributes {stable_mosaic.version = 11 : i64} {
  func.func @_matmul_bias_kernel(%arg0: i32, %arg1: i32, %arg2: memref<8x16xbf16, #tpu.memory_space<vmem>>, %arg3: memref<16x96xbf16, #tpu.memory_space<vmem>>, %arg4: memref<1x96xf32, #tpu.memory_space<vmem>>, %arg5: memref<8x96xbf16, #tpu.memory_space<vmem>>) attributes {dimension_semantics = [#tpu.dimension_semantics<parallel>, #tpu.dimension_semantics<parallel>], iteration_bounds = array<i64: 2, 1>, scalar_prefetch = 0 : i64, scratch_operands = 0 : i64, tpu.core_type = #tpu.core_type<tc>, window_params = [{transform_indices = @transform_0, window_bounds = array<i64: 8, 16>}, {transform_indices = @transform_1, window_bounds = array<i64: 16, 96>}, {transform_indices = @transform_2, window_bounds = array<i64: 1, 96>}, {transform_indices = @transform_3, window_bounds = array<i64: 8, 96>}]} {
    %c0 = arith.constant 0 : index
    %c0_0 = arith.constant 0 : index
    %0 = vector.load %arg2[%c0, %c0_0] : memref<8x16xbf16, #tpu.memory_space<vmem>>, vector<8x16xbf16>
    %c0_1 = arith.constant 0 : index
    %c0_2 = arith.constant 0 : index
    %1 = vector.load %arg3[%c0_1, %c0_2] : memref<16x96xbf16, #tpu.memory_space<vmem>>, vector<16x96xbf16>
    %cst = arith.constant dense<0.000000e+00> : vector<8x96xf32>
    %2 = tpu.matmul %0, %1, %cst {dimension_numbers = #tpu.dot_dimension_numbers<[1], [0], [0], [1], [0, 0, 1, 1], [], []>} : vector<8x16xbf16>, vector<16x96xbf16>, vector<8x96xf32> -> vector<8x96xf32>
    %c0_3 = arith.constant 0 : index
    %c0_4 = arith.constant 0 : index
    %3 = vector.load %arg4[%c0_3, %c0_4] : memref<1x96xf32, #tpu.memory_space<vmem>>, vector<1x96xf32>
    %4 = vector.broadcast %3 : vector<1x96xf32> to vector<8x96xf32>
    %5 = arith.addf %2, %4 : vector<8x96xf32>
    %6 = arith.truncf %5 : vector<8x96xf32> to vector<8x96xbf16>
    %c0_5 = arith.constant 0 : index
    %c0_6 = arith.constant 0 : index
    %7 = vector.load %arg5[%c0_5, %c0_6] : memref<8x96xbf16, #tpu.memory_space<vmem>>, vector<8x96xbf16>
    tpu.vector_store %arg5[%c0_5, %c0_6], %6 {strides = array<i32>} : memref<8x96xbf16, #tpu.memory_space<vmem>>, vector<8x96xbf16>,
    return
  }
  func.func @transform_0(%arg0: i32, %arg1: i32) -> (i32, i32) {
    %c0_i32 = arith.constant 0 : i32
    %c0_i32_0 = arith.constant 0 : i32
    return %arg0, %c0_i32 : i32, i32
  }
  func.func @transform_1(%arg0: i32, %arg1: i32) -> (i32, i32) {
    %c0_i32 = arith.constant 0 : i32
    %c0_i32_0 = arith.constant 0 : i32
    return %c0_i32, %arg1 : i32, i32
  }
  func.func @transform_2(%arg0: i32, %arg1: i32) -> (i32, i32) {
    %c0_i32 = arith.constant 0 : i32
    %c0_i32_0 = arith.constant 0 : i32
    return %c0_i32, %arg1 : i32, i32
  }
  func.func @transform_3(%arg0: i32, %arg1: i32) -> (i32, i32) {
    %c0_i32 = arith.constant 0 : i32
    return %arg0, %arg1 : i32, i32
  }
}

</mosaic_0001>

<bundles_post_ra>
// kernel: tpu_custom_call.1
= control target key start
LH: loop header
LB: loop body
LE: loop exit
PB: predicated region body
PF: predicated region fallthrough
CT: control target
= control target key end

     0   :  { %8 = vsyncpa [#allocation3], 0  ;;  %s809_s0 = inlined_call_operand.hbm [shape: bf16[16,16], index: 0, kind: input, shape index: {}]   ;;  %s810_s1 = inlined_call_operand.hbm [shape: bf16[16,96], index: 1, kind: input, shape index: {}]   ;;  %s811_s2 = inlined_call_operand.vmem [shape: f32[1,96], index: 2, kind: input, shape index: {}]   ;;  %s812_s3 = inlined_call_operand.hbm [shape: bf16[16,96], index: 3, kind: output, shape index: {}]  }
   0x1   :  { %10 = vsyncpa [#allocation3 + $0x1], 0 }
   0x2   :  { %11 = vsyncpa [#allocation6], 0 }
   0x3   :  { %12 = vsyncpa [#allocation4], 0 }
   0x4   :  { %14 = vsyncpa [#allocation4 + $0x1], 0  ;;  %s663_s12 = smov 0   ;;  %s665_s13 = smov 0  }
   0x5   :  { %s667_s14 = smov 0   ;;  %s669_s15 = smov 0  }
   0x6   :  { %s671_s16 = smov 0   ;;  %s673_s17 = smov 0  }
   0x7 LB: > { %s394_s18 = sadd.s32 4294967295, %s638_s17   ;;  %p396_p0 = scmp.ge.s32.totalorder %s638_s17, 1  ;;  %s638_s17 = sphi %s673_s17, %s20_s17   ;;  %s634_s16 = sphi %s671_s16, %s823_s16   ;;  %s630_s15 = sphi %s669_s15, %s822_s15   ;;  %s626_s14 = sphi %s667_s14, %s821_s14   ;;  %s622_s13 = sphi %s665_s13, %s820_s13   ;;  %s618_s12 = sphi %s663_s12, %s819_s12  }
   0x8   : > { %p695_p1 = scmp.eq.s32.totalorder %s394_s18, 0  ;;  %p143_p2 = scmp.lt.s32.totalorder %s638_s17, 3 }
   0x9   : > { %s156_s22 = sshll.u32 %s810_s1, 4  ;;  %s640_s24 = smov [#allocation5]   ;;  %s157_s22 = int_to_ptr.hbm [resolvable:$true] %s156_s22 }
   0xa   : > { %p703_p3 = pnand %p396_p0, %p143_p2  ;;  %s158_s25 = sshll.u32 %s640_s24, 4  ;;  %s159_s25 = int_to_ptr.vmem [resolvable:$true] %s158_s25 }
   0xb   : > { %p399_p6 = scmp.ge.s32.totalorder %s638_s17, 2  ;;  %s641_s26 = smov 64  }
   0xc   : > { %p424_p4 = pneg %p703_p3  ;;  %s642_s27 = smov 4  }
   0xd   : > { %s395_s28 = sadd.s32 4294967294, %s638_s17   ;;  %s32_s29 = sadd.s32 1, %s634_s16 }
   0xe   : > { %p425_p5 = pnand %p424_p4, %p695_p1  ;;  %s39_s30 = sadd.s32 1, %s626_s14 }
   0xf   : > { %p34_p7 = scmp.ge.s32.totalorder %s32_s29, 2  ;;  %p46_p8 = scmp.ne.s32.totalorder %s626_s14, %s622_s13 }
  0x10   : > { %427 = dma.hbm_to_vmem [thread:$0]  (!%p425_p5), %s157_s22, 128, %s159_s25, [#allocation6], %s641_s26, %s641_s26, %s642_s27  }
  0x11   : > { %p47_p9 = scmp.eq.s32.totalorder %s638_s17, 0  ;;  %p52_p10 = scmp.ne.s32.totalorder %s622_s13, %s618_s12 }
  0x12   : > { %s825_s29 = smov (%p34_p7, %s32_s29), 0  ;;  %p130_p13 = scmp.eq.s32.totalorder %s394_s18, 1 }
  0x13   : > { %p722_p11 = por %p47_p9, %p46_p8  ;;  %p728_p12 = por %p695_p1, %p52_p10 }
  0x14   : > { %s36_s6 = ssub.s32 %s634_s16, %s825_s29  ;;  %p136_p2 = scmp.eq.s32.totalorder %s395_s28, 1 }
  0x15   : > { %p37_p0 = scmp.eq.s32.totalorder %s36_s6, 0  ;;  %p734_p4 = por %p130_p13, %p46_p8 }
  0x16   : > { %p437_p5 = scmp.lt.s32.totalorder %s638_s17, 2  ;;  %p742_p7 = por %p136_p2, %p52_p10 }
  0x17   : > { %s740_s8 = scalar_select %p37_p0, %s626_s14, %s39_s30  }
  0x18   : > { %s178_s10 = sand.u32 1, %s626_s14   ;;  %s401_s20 = sshll.u32 %s634_s16, 2 }
  0x19   : > { %s400_s11 = sshll.u32 %s178_s10, 2  ;;  %s186_s18 = scalar_lea.hbm %s809_s0, %s401_s20 }
  0x1a   : > { %s182_s24 = scalar_lea.vmem [#allocation2], %s400_s11  ;;  %s188_s26 = sshll.u32 %s186_s18, 4  ;;  %s189_s26 = int_to_ptr.hbm [resolvable:$true] %s188_s26 }
  0x1b   : > { %s190_s25 = sshll.u32 %s182_s24, 4  ;;  %p429_p8 = pnand %p437_p5, %p722_p11  ;;  %s191_s25 = int_to_ptr.vmem [resolvable:$true] %s190_s25 }
  0x1c   : > { %s179_s27 = scalar_lea.sflag [#allocation3], %s178_s10  ;;  %199 = sbr.rel (%p703_p3) target bundleno = 174 (0xae), region = 32 }
  0x1d   : > { %431 = dma.hbm_to_vmem [thread:$0]  (!%p429_p8), %s189_s26, 64, %s191_s25, %s179_s27  }
  0x1e   : > { %s756_s28 = sand.u32 (!%p703_p3), 1, %s622_s13  }
  0x1f   : > { %s403_s30 = sshll.u32 (!%p703_p3), %s756_s28, 2  ;;  %s202_s6 = scalar_lea.sflag (!%p703_p3), [#allocation3], %s756_s28 }
  0x20   : > { %s205_s11 = scalar_lea.vmem (!%p703_p3), [#allocation2], %s403_s30 }
  0x21   : > { %605 = dma.done.wait (%p728_p12), %s202_s6, 64  }
  0x22   : > { %607 = vsyncadd (%p728_p12), %s202_s6, 4294967232 }
  0x23   : > { %609 = dma.done.wait (%p695_p1), [#allocation6], 128  }
  0x24   : > { %611 = vsyncadd (%p695_p1), [#allocation6], 4294967168  ;;  %v415_v0 = vld [vmem:[#allocation5] sm:$0xff]  ;;  %v241_v1 = vld [vmem:[%s205_s11] sm:$0xf]  ;;  %vm254_vm0 = vcmask 130048  }
  0x25   : > { %265 = vmatpush.bf16.msra.mxu0 %v415_v0  ;;  %s412_s23 = sshll.u32 %s630_s15, 2  ;;  %v491_v2 = vld [vmem:[%s811_s2] ss:$0 sm:$0xff]  ;;  %s236_s19 = scalar_lea.vmem [#allocation7], %s403_s30  ;;  %vm272_vm1 = vcmask 781312  }
  0x26   : > { %s286_s21 = scalar_lea.hbm %s812_s3, %s412_s23  ;;  %s288_s22 = sshll.u32 %s236_s19, 4  ;;  %s289_s22 = int_to_ptr.vmem [resolvable:$true] %s288_s22 }
  0x27   : > { %s290_s18 = sshll.u32 %s286_s21, 4  ;;  %s275_s15 = scalar_lea.sflag [#allocation4], %s756_s28  ;;  %s291_s18 = int_to_ptr.hbm [resolvable:$true] %s290_s18 }
  0x28   : > { %410 = vmatmul.msk.bf16.vlgmr.msra.gmra.mxu0 %vm254_vm0, %v241_v1  ;;  %s566_s24 = sshra.s32 %s291_s18, 4  ;;  %s572_s30 = scalar_lea.hbm %s812_s3, 8  ;;  %s567_s24 = int_to_ptr.hbm [resolvable:$true] %s566_s24 }
  0x29   : > { %s568_s25 = scalar_lea.hbm %s567_s24, 4  ;;  %p573_p10 = scmp.lt.s32.totalorder %s567_s24, %s812_s3 }
  0x2a   : > { %p569_p1 = scmp.ne.s32.totalorder %s567_s24, %s568_s25  ;;  %p574_p11 = scmp.lt.s32.totalorder %s572_s30, %s568_s25 }
  0x2c   : > { %p570_p3 = pnand %p569_p1, %p734_p4  ;;  %p575_p12 = por %p574_p11, %p573_p10 }
  0x2e   : > { %p571_p9 = pneg %p570_p3 }
  0x30   : > { %p576_p13 = pnand %p575_p12, %p571_p9 }
  0xa5   : > { %v267_v3 = vpop.f32.mrf.mxu0 }
  0xa6   : > { %v268_v4 = vadd.f32 %v491_v2, %v267_v3 }
  0xa8   : > { %v271_v5 = vpack.c.bf16 %v268_v4, %v268_v4 }
  0xaa   : > { %273 = vst.msk [vmem:[%s236_s19] sm:$0xf] %vm272_vm1, %v271_v5 }
  0xab   : > { %579 = shalt.err (!%p576_p13)
}
  0xac   : > { %422 = dma.vmem_to_hbm [thread:$0]  (%p734_p4), %s289_s22, 64, %s291_s18, %s275_s15  }
  0xad   : > { %v269_v6 = vpop.f32.mrf.mxu0 }
  0xae PF: > { %s302_s28 = sand.u32 1, %s618_s12   ;;  %p433_p0 = pnand %p399_p6, %p742_p7 }
  0xaf   : > { %s303_s23 = scalar_lea.sflag [#allocation4], %s302_s28 }
  0xb0   : > { %p434_p2 = pneg %p433_p0 }
  0xb2   : > { %613 = dma.done.wait (%p434_p2), %s303_s23, 64  }
  0xb3   : > { %615 = vsyncadd (%p434_p2), %s303_s23, 4294967232  ;;  %s20_s17 = sadd.s32 1, %s638_s17   ;;  %s819_s12 = smov %s622_s13 }
  0xb4   : > { %p17_p5 = scmp.ge.s32.totalorder %s20_s17, 4   ;;  %s820_s13 = smov %s626_s14 }
  0xb5   : > { %s821_s14 = smov %s740_s8  ;;  %s822_s15 = smov %s634_s16 }
  0xb6   : > { %s823_s16 = smov %s825_s29  ;;  %19 = sbr.rel (!%p17_p5) target bundleno = 7 (0x7), region = 85 }
  0xbb   :  { %309 = vsyncpa [#allocation3], 1 }
  0xbc   :  { %311 = vsyncpa [#allocation3 + $0x1], 1 }
  0xbd   :  { %312 = vsyncpa [#allocation6], 1 }
  0xbe   :  { %313 = vsyncpa [#allocation4], 1 }
  0xbf   :  { %315 = vsyncpa [#allocation4 + $0x1], 1 }

</bundles_post_ra>
